<compile_context>
chip_gen: v6e
topology: v6e:2x2x1
jax: 0.10.0
libtpu: 0.0.40
codegen_flags: <defaults>
</compile_context>

<pallas_src>
import jax
import jax.numpy as jnp
from jax.experimental import pallas as pl
from jax.experimental.pallas import tpu as pltpu


# Padded (lane-dense) dimensions used by the fused kernel.
_KP = 32     # im2col contraction dim: 9*Cin = 27 -> 32
_CP = 128    # feature channels:       32 -> 128
_CRP = 128   # SE bottleneck:           8 -> 128
_NCP = 128   # classes:               101 -> 128
_BIAS_ROWS = 8   # packed bias slab (rows 0..3 used), full sublane tile


# --------------------------------------------------------------------------
# Fused kernel: conv(im2col matmul)+bias+ReLU -> GAP -> SE gate -> classifier
# One grid step == B images; the feature map never leaves VMEM/vregs.
# --------------------------------------------------------------------------
def _make_kernel(B, HW, KP, CP, CRP, NCP):
    inv_hw = 1.0 / HW   # true spatial size (no padded rows in HW here)

    def kernel(a_ref, cw_ref, w1_ref, w2_ref, fw_ref, b_ref, o_ref):
        # Packed biases: row 0 = conv_b, 1 = se_b1, 2 = se_b2, 3 = fc_b.
        biases = b_ref[...]
        cb, b1, b2, fb = biases[0:1], biases[1:2], biases[2:3], biases[3:4]

        # conv stem: one (B*HW, KP) @ (KP, CP) bf16 matmul, f32 accumulation.
        a = a_ref[...].reshape(B * HW, KP)
        feat = jnp.dot(a, cw_ref[...], preferred_element_type=jnp.float32)
        feat = jnp.maximum(feat + cb, 0.0)                       # (B*HW, CP)

        # Squeeze: per-image global average pool.
        pooled = feat.reshape(B, HW, CP).sum(axis=1) * inv_hw    # (B, CP)

        # Excitation: fc1 + ReLU -> fc2 -> exact sigmoid.
        h = jnp.dot(pooled.astype(jnp.bfloat16), w1_ref[...],
                    preferred_element_type=jnp.float32)
        h = jnp.maximum(h + b1, 0.0)                             # (B, CRP)
        s = jnp.dot(h.astype(jnp.bfloat16), w2_ref[...],
                    preferred_element_type=jnp.float32) + b2     # (B, CP)
        s = 1.0 / (1.0 + jnp.exp(-s))                            # exact sigmoid

        # Algebraic fusion: GAP(feat * s) == GAP(feat) * s, so only the pooled
        # vector is rescaled (no full-feature multiply / second reduction).
        pooled2 = pooled * s                                     # (B, CP)

        # Classifier head.
        logits = jnp.dot(pooled2.astype(jnp.bfloat16), fw_ref[...],
                         preferred_element_type=jnp.float32)
        o_ref[0] = logits + fb                                   # (B, NCP)

    return kernel


def fused_forward(a, conv_w, se_w1, se_w2, fc_w, biases, *, images_per_step=None):
    """a: (N, HW, KP) bf16 im2col patches; weights bf16 lane-padded; biases (8,128) f32."""
    N, HW, KP = a.shape
    CP = conv_w.shape[1]
    CRP = se_w1.shape[1]
    NCP = fc_w.shape[1]

    if images_per_step is None:
        # Fold as many images per step as possible (amortizes per-step pipeline
        # overhead, gives the MXU B*HW / B rows) while keeping >=2 grid steps so
        # dimension_semantics=("parallel",) can shard across v7x's two TCs.
        B = max(1, N // 2)
    else:
        B = images_per_step
    while N % B:
        B -= 1
    grid = N // B

    kernel = _make_kernel(B, HW, KP, CP, CRP, NCP)

    flops = N * (2 * HW * KP * CP + 3 * HW * CP + 2 * CP * CRP
                 + 2 * CRP * CP + CP + 2 * CP * NCP)
    transcendentals = N * CP                       # exp per image
    bytes_accessed = (2 * (a.size + conv_w.size + se_w1.size + se_w2.size + fc_w.size)
                      + 4 * (biases.size + N * NCP))

    out = pl.pallas_call(
        kernel,
        out_shape=jax.ShapeDtypeStruct((grid, B, NCP), jnp.float32),
        grid=(grid,),
        in_specs=[
            pl.BlockSpec((B, HW, KP), lambda n: (n, 0, 0)),
            # Constant operands (block index always (0,0)) — fetched once.
            pl.BlockSpec((KP, CP), lambda n: (0, 0)),
            pl.BlockSpec((CP, CRP), lambda n: (0, 0)),
            pl.BlockSpec((CRP, CP), lambda n: (0, 0)),
            pl.BlockSpec((CP, NCP), lambda n: (0, 0)),
            pl.BlockSpec(biases.shape, lambda n: (0, 0)),
        ],
        out_specs=pl.BlockSpec((1, B, NCP), lambda n: (n, 0, 0)),
        compiler_params=pltpu.CompilerParams(
            dimension_semantics=("parallel",)),
        cost_estimate=pl.CostEstimate(
            flops=int(flops), transcendentals=int(transcendentals),
            bytes_accessed=int(bytes_accessed)),
    )(a, conv_w, se_w1, se_w2, fc_w, biases)
    return out.reshape(N, NCP)


# --------------------------------------------------------------------------
# Glue: im2col patch extraction, lane-dense zero padding, bias packing
# --------------------------------------------------------------------------
def _im2col_3x3(x_nhwc, kp):
    """3x3 conv, stride 1, pad 1 im2col -> (N, H*W, kp), K zero-padded to kp."""
    # TODO(synk): move im2col in-kernel (or use lax.conv_general_dilated_patches)
    #             at real SENet-154 sizes to avoid the 9x HBM expansion.
    N, H, W, Cin = x_nhwc.shape
    xp = jnp.pad(x_nhwc, ((0, 0), (1, 1), (1, 1), (0, 0)))
    patches = [xp[:, dy:dy + H, dx:dx + W, :]
               for dy in range(3) for dx in range(3)]
    a = jnp.concatenate(patches, axis=-1).reshape(N, H * W, 9 * Cin)
    return jnp.pad(a, ((0, 0), (0, 0), (0, kp - 9 * Cin)))


def _pad2(x, rows, cols):
    return jnp.pad(x, ((0, rows - x.shape[0]), (0, cols - x.shape[1])))


def _pack_biases(conv_b, se_b1, se_b2, fc_b, lane=128, rows=_BIAS_ROWS):
    packed = jnp.zeros((rows, lane), jnp.float32)
    for i, b in enumerate((conv_b, se_b1, se_b2, fc_b)):
        packed = packed.at[i, :b.shape[0]].set(b.astype(jnp.float32))
    return packed


def init_params(key, cin=3, c=32, reduction=4, num_classes=101):
    ks = jax.random.split(key, 6)
    cr = c // reduction
    scale = lambda fan_in: 1.0 / jnp.sqrt(jnp.float32(fan_in))
    return {
        "conv_w": jax.random.normal(ks[0], (9 * cin, c), jnp.float32) * scale(9 * cin),
        "conv_b": jax.random.normal(ks[1], (c,), jnp.float32) * 0.01,
        "se_w1": jax.random.normal(ks[2], (c, cr), jnp.float32) * scale(c),
        "se_b1": jnp.zeros((cr,), jnp.float32),
        "se_w2": jax.random.normal(ks[3], (cr, c), jnp.float32) * scale(cr),
        "se_b2": jnp.zeros((c,), jnp.float32),
        "fc_w": jax.random.normal(ks[4], (c, num_classes), jnp.float32) * scale(c),
        "fc_b": jax.random.normal(ks[5], (num_classes,), jnp.float32) * 0.01,
    }


@jax.jit
def teacher_forward(x_nchw, params):
    # layout: PyTorch NCHW -> NHWC so channels land on the lane dimension
    x = jnp.transpose(x_nchw, (0, 2, 3, 1)).astype(jnp.float32)
    num_classes = params["fc_w"].shape[1]

    a = _im2col_3x3(x, _KP).astype(jnp.bfloat16)               # (N, HW, 32) bf16
    # Zero-padding weights/biases to lane-dense sizes keeps the math exact:
    # padded feature channels are ReLU(0)=0 so they contribute nothing downstream
    # (and pooled padded channels are 0, so the fused SE gate is also exact).
    logits_p = fused_forward(
        a,
        _pad2(params["conv_w"], _KP, _CP).astype(jnp.bfloat16),
        _pad2(params["se_w1"], _CP, _CRP).astype(jnp.bfloat16),
        _pad2(params["se_w2"], _CRP, _CP).astype(jnp.bfloat16),
        _pad2(params["fc_w"], _CP, _NCP).astype(jnp.bfloat16),
        _pack_biases(params["conv_b"], params["se_b1"],
                     params["se_b2"], params["fc_b"]),
    )
    return logits_p[:, :num_classes]


# --------------------------------------------------------------------------
# Pure-JAX f32 reference for sanity checking
# --------------------------------------------------------------------------
def reference_forward(x_nchw, params):
    x = jnp.transpose(x_nchw, (0, 2, 3, 1)).astype(jnp.float32)
    N, H, W, Cin = x.shape
    xp = jnp.pad(x, ((0, 0), (1, 1), (1, 1), (0, 0)))
    patches = [xp[:, dy:dy + H, dx:dx + W, :] for dy in range(3) for dx in range(3)]
    a = jnp.concatenate(patches, axis=-1).reshape(N * H * W, 9 * Cin)
    feat = jnp.maximum(a @ params["conv_w"] + params["conv_b"], 0.0)
    C = feat.shape[-1]
    feat = feat.reshape(N, H * W, C)
    pooled = feat.mean(axis=1)
    h = jnp.maximum(pooled @ params["se_w1"] + params["se_b1"], 0.0)
    s = jax.nn.sigmoid(h @ params["se_w2"] + params["se_b2"])
    feat = feat * s[:, None, :]
    return feat.mean(axis=1) @ params["fc_w"] + params["fc_b"]


if __name__ == "__main__":
    key = jax.random.PRNGKey(0)
    kx, kp = jax.random.split(key)
    # Input matches senet154's image convention (NCHW, 3 channels) at a small
    # synthetic spatial size.
    x = jax.random.normal(kx, (2, 3, 16, 16), jnp.float32)
    params = init_params(kp)

    logits = teacher_forward(x, params)
    jax.block_until_ready(logits)

    ref = reference_forward(x, params)
    assert logits.shape == (2, 101), logits.shape
    # Tolerance covers bf16 MXU inputs (f32 accumulation); sigmoid/divide are exact.
    assert jnp.allclose(logits, ref, atol=2e-2, rtol=2e-2), (
        float(jnp.max(jnp.abs(logits - ref))))

    print("KERNEL_OK")
</pallas_src>

<mosaic_0001>
module attributes {stable_mosaic.version = 11 : i64} {
  func.func @kernel(%arg0: i32, %arg1: memref<1x256x32xbf16, #tpu.memory_space<vmem>>, %arg2: memref<32x128xbf16, #tpu.memory_space<vmem>>, %arg3: memref<128x128xbf16, #tpu.memory_space<vmem>>, %arg4: memref<128x128xbf16, #tpu.memory_space<vmem>>, %arg5: memref<128x128xbf16, #tpu.memory_space<vmem>>, %arg6: memref<8x128xf32, #tpu.memory_space<vmem>>, %arg7: memref<1x1x128xf32, #tpu.memory_space<vmem>>) attributes {dimension_semantics = [#tpu.dimension_semantics<parallel>], iteration_bounds = array<i64: 2>, scalar_prefetch = 0 : i64, scratch_operands = 0 : i64, tpu.core_type = #tpu.core_type<tc>, window_params = [{transform_indices = @transform_0, window_bounds = array<i64: 1, 256, 32>}, {pipeline_mode = #tpu.pipeline_mode<synchronous>, transform_indices = @transform_1, window_bounds = array<i64: 32, 128>}, {pipeline_mode = #tpu.pipeline_mode<synchronous>, transform_indices = @transform_2, window_bounds = array<i64: 128, 128>}, {pipeline_mode = #tpu.pipeline_mode<synchronous>, transform_indices = @transform_3, window_bounds = array<i64: 128, 128>}, {pipeline_mode = #tpu.pipeline_mode<synchronous>, transform_indices = @transform_4, window_bounds = array<i64: 128, 128>}, {pipeline_mode = #tpu.pipeline_mode<synchronous>, transform_indices = @transform_5, window_bounds = array<i64: 8, 128>}, {transform_indices = @transform_6, window_bounds = array<i64: 1, 1, 128>}]} {
    %c0 = arith.constant 0 : index
    %c0_0 = arith.constant 0 : index
    %0 = vector.load %arg6[%c0, %c0_0] : memref<8x128xf32, #tpu.memory_space<vmem>>, vector<8x128xf32>
    %1 = vector.extract_strided_slice %0 {offsets = [0, 0], sizes = [1, 128], strides = [1, 1]} : vector<8x128xf32> to vector<1x128xf32>
    %2 = vector.extract_strided_slice %0 {offsets = [1, 0], sizes = [1, 128], strides = [1, 1]} : vector<8x128xf32> to vector<1x128xf32>
    %3 = vector.extract_strided_slice %0 {offsets = [2, 0], sizes = [1, 128], strides = [1, 1]} : vector<8x128xf32> to vector<1x128xf32>
    %4 = vector.extract_strided_slice %0 {offsets = [3, 0], sizes = [1, 128], strides = [1, 1]} : vector<8x128xf32> to vector<1x128xf32>
    %c0_1 = arith.constant 0 : index
    %c0_2 = arith.constant 0 : index
    %c0_3 = arith.constant 0 : index
    %5 = vector.load %arg1[%c0_1, %c0_2, %c0_3] : memref<1x256x32xbf16, #tpu.memory_space<vmem>>, vector<1x256x32xbf16>
    %6 = vector.shape_cast %5 : vector<1x256x32xbf16> to vector<256x32xbf16>
    %c0_4 = arith.constant 0 : index
    %c0_5 = arith.constant 0 : index
    %7 = vector.load %arg2[%c0_4, %c0_5] : memref<32x128xbf16, #tpu.memory_space<vmem>>, vector<32x128xbf16>
    %cst = arith.constant dense<0.000000e+00> : vector<256x128xf32>
    %8 = tpu.matmul %6, %7, %cst {dimension_numbers = #tpu.dot_dimension_numbers<[1], [0], [0], [1], [0, 0, 1, 1], [], []>} : vector<256x32xbf16>, vector<32x128xbf16>, vector<256x128xf32> -> vector<256x128xf32>
    %9 = vector.broadcast %1 : vector<1x128xf32> to vector<256x128xf32>
    %10 = arith.addf %8, %9 : vector<256x128xf32>
    %cst_6 = arith.constant 0.000000e+00 : f32
    %11 = vector.broadcast %cst_6 : f32 to vector<256x128xf32>
    %12 = arith.maximumf %10, %11 : vector<256x128xf32>
    %13 = vector.shape_cast %12 : vector<256x128xf32> to vector<1x256x128xf32>
    %cst_7 = arith.constant dense<0.000000e+00> : vector<1x128xf32>
    %14 = vector.multi_reduction <add>, %13, %cst_7 [1] : vector<1x256x128xf32> to vector<1x128xf32>
    %cst_8 = arith.constant 3.906250e-03 : f32
    %15 = vector.broadcast %cst_8 : f32 to vector<1x128xf32>
    %16 = arith.mulf %14, %15 : vector<1x128xf32>
    %17 = arith.truncf %16 : vector<1x128xf32> to vector<1x128xbf16>
    %c0_9 = arith.constant 0 : index
    %c0_10 = arith.constant 0 : index
    %18 = vector.load %arg3[%c0_9, %c0_10] : memref<128x128xbf16, #tpu.memory_space<vmem>>, vector<128x128xbf16>
    %cst_11 = arith.constant dense<0.000000e+00> : vector<1x128xf32>
    %19 = tpu.matmul %17, %18, %cst_11 {dimension_numbers = #tpu.dot_dimension_numbers<[1], [0], [0], [1], [0, 0, 1, 1], [], []>} : vector<1x128xbf16>, vector<128x128xbf16>, vector<1x128xf32> -> vector<1x128xf32>
    %20 = arith.addf %19, %2 : vector<1x128xf32>
    %cst_12 = arith.constant 0.000000e+00 : f32
    %21 = vector.broadcast %cst_12 : f32 to vector<1x128xf32>
    %22 = arith.maximumf %20, %21 : vector<1x128xf32>
    %23 = arith.truncf %22 : vector<1x128xf32> to vector<1x128xbf16>
    %c0_13 = arith.constant 0 : index
    %c0_14 = arith.constant 0 : index
    %24 = vector.load %arg4[%c0_13, %c0_14] : memref<128x128xbf16, #tpu.memory_space<vmem>>, vector<128x128xbf16>
    %cst_15 = arith.constant dense<0.000000e+00> : vector<1x128xf32>
    %25 = tpu.matmul %23, %24, %cst_15 {dimension_numbers = #tpu.dot_dimension_numbers<[1], [0], [0], [1], [0, 0, 1, 1], [], []>} : vector<1x128xbf16>, vector<128x128xbf16>, vector<1x128xf32> -> vector<1x128xf32>
    %26 = arith.addf %25, %3 : vector<1x128xf32>
    %cst_16 = arith.constant 0.000000e+00 : f32
    %27 = vector.broadcast %cst_16 : f32 to vector<1x128xf32>
    %28 = arith.subf %27, %26 : vector<1x128xf32>
    %29 = math.exp %28 : vector<1x128xf32>
    %cst_17 = arith.constant 1.000000e+00 : f32
    %30 = vector.broadcast %cst_17 : f32 to vector<1x128xf32>
    %31 = arith.addf %30, %29 : vector<1x128xf32>
    %cst_18 = arith.constant 1.000000e+00 : f32
    %32 = vector.broadcast %cst_18 : f32 to vector<1x128xf32>
    %33 = arith.divf %32, %31 : vector<1x128xf32>
    %34 = arith.mulf %16, %33 : vector<1x128xf32>
    %35 = arith.truncf %34 : vector<1x128xf32> to vector<1x128xbf16>
    %c0_19 = arith.constant 0 : index
    %c0_20 = arith.constant 0 : index
    %36 = vector.load %arg5[%c0_19, %c0_20] : memref<128x128xbf16, #tpu.memory_space<vmem>>, vector<128x128xbf16>
    %cst_21 = arith.constant dense<0.000000e+00> : vector<1x128xf32>
    %37 = tpu.matmul %35, %36, %cst_21 {dimension_numbers = #tpu.dot_dimension_numbers<[1], [0], [0], [1], [0, 0, 1, 1], [], []>} : vector<1x128xbf16>, vector<128x128xbf16>, vector<1x128xf32> -> vector<1x128xf32>
    %38 = arith.addf %37, %4 : vector<1x128xf32>
    %c0_22 = arith.constant 0 : index
    %c0_23 = arith.constant 0 : index
    %c0_24 = arith.constant 0 : index
    %39 = vector.load %arg7[%c0_22, %c0_23, %c0_24] : memref<1x1x128xf32, #tpu.memory_space<vmem>>, vector<1x1x128xf32>
    %40 = vector.shape_cast %39 : vector<1x1x128xf32> to vector<1x128xf32>
    %41 = vector.shape_cast %38 : vector<1x128xf32> to vector<1x1x128xf32>
    tpu.vector_store %arg7[%c0_22, %c0_23, %c0_24], %41 {strides = array<i32>} : memref<1x1x128xf32, #tpu.memory_space<vmem>>, vector<1x1x128xf32>,
    return
  }
  func.func @transform_0(%arg0: i32) -> (i32, i32, i32) {
    %c0_i32 = arith.constant 0 : i32
    %c0_i32_0 = arith.constant 0 : i32
    %c0_i32_1 = arith.constant 0 : i32
    return %arg0, %c0_i32, %c0_i32_0 : i32, i32, i32
  }
  func.func @transform_1(%arg0: i32) -> (i32, i32) {
    %c0_i32 = arith.constant 0 : i32
    %c0_i32_0 = arith.constant 0 : i32
    %c0_i32_1 = arith.constant 0 : i32
    return %c0_i32, %c0_i32_0 : i32, i32
  }
  func.func @transform_2(%arg0: i32) -> (i32, i32) {
    %c0_i32 = arith.constant 0 : i32
    %c0_i32_0 = arith.constant 0 : i32
    %c0_i32_1 = arith.constant 0 : i32
    return %c0_i32, %c0_i32_0 : i32, i32
  }
  func.func @transform_3(%arg0: i32) -> (i32, i32) {
    %c0_i32 = arith.constant 0 : i32
    %c0_i32_0 = arith.constant 0 : i32
    %c0_i32_1 = arith.constant 0 : i32
    return %c0_i32, %c0_i32_0 : i32, i32
  }
  func.func @transform_4(%arg0: i32) -> (i32, i32) {
    %c0_i32 = arith.constant 0 : i32
    %c0_i32_0 = arith.constant 0 : i32
    %c0_i32_1 = arith.constant 0 : i32
    return %c0_i32, %c0_i32_0 : i32, i32
  }
  func.func @transform_5(%arg0: i32) -> (i32, i32) {
    %c0_i32 = arith.constant 0 : i32
    %c0_i32_0 = arith.constant 0 : i32
    %c0_i32_1 = arith.constant 0 : i32
    return %c0_i32, %c0_i32_0 : i32, i32
  }
  func.func @transform_6(%arg0: i32) -> (i32, i32, i32) {
    %c0_i32 = arith.constant 0 : i32
    %c0_i32_0 = arith.constant 0 : i32
    %c0_i32_1 = arith.constant 0 : i32
    return %arg0, %c0_i32, %c0_i32_0 : i32, i32, i32
  }
}

</mosaic_0001>

<bundles_post_ra>
// kernel: teacher_forward.1
= control target key start
LH: loop header
LB: loop body
LE: loop exit
PB: predicated region body
PF: predicated region fallthrough
CT: control target
= control target key end

     0   :  { %11 = vsyncpa [#allocation3], 0  ;;  %s1747_s0 = inlined_call_operand.vmem [shape: bf16[2,256,32], index: 0, kind: input, shape index: {}]   ;;  %s1748_s1 = inlined_call_operand.vmem [shape: bf16[32,128], index: 1, kind: input, shape index: {}]   ;;  %s1749_s2 = inlined_call_operand.vmem [shape: bf16[128,128], index: 2, kind: input, shape index: {}]   ;;  %s1750_s3 = inlined_call_operand.vmem [shape: bf16[128,128], index: 3, kind: input, shape index: {}]   ;;  %s1751_s4 = inlined_call_operand.vmem [shape: bf16[128,128], index: 4, kind: input, shape index: {}]   ;;  %s1752_s5 = inlined_call_operand.vmem [shape: f32[8,128], index: 5, kind: input, shape index: {}]   ;;  %s1753_s6 = inlined_call_operand.hbm [shape: f32[2,1,128], index: 6, kind: output, shape index: {}]  }
   0x1   :  { %13 = vsyncpa [#allocation3 + $0x1], 0  ;;  %s1458_s21 = smov 0   ;;  %s1460_s22 = smov 0  }
   0x2   :  { %s1462_s23 = smov 0   ;;  %s1464_s24 = smov 0  }
   0x3 LB: > { %s1479_s25 = sadd.s32 4294967295, %s1418_s24   ;;  %s1062_s26 = sadd.s32 4294967294, %s1418_s24   ;;  %s1418_s24 = sphi %s1464_s24, %s1759_s24   ;;  %s1414_s23 = sphi %s1462_s23, %s1758_s23   ;;  %s1410_s22 = sphi %s1460_s22, %s1757_s22   ;;  %s1406_s21 = sphi %s1458_s21, %s1756_s21  }
   0x4   : > { %s1483_s27 = sadd.s32 1, %s1418_s24   ;;  %s157_s28 = sadd.s32 1, %s1414_s23 }
   0x5   : > { %s154_s29 = ssub.s32 %s1418_s24, %s1483_s27  ;;  %p167_p0 = scmp.ne.s32.totalorder %s1414_s23, %s1410_s22 }
   0x6   : > { %p155_p1 = scmp.eq.s32.totalorder %s154_s29, 0  ;;  %p168_p2 = scmp.eq.s32.totalorder %s1479_s25, 1 }
   0x7   : > { %p173_p3 = scmp.ne.s32.totalorder %s1410_s22, %s1406_s21  ;;  %p174_p4 = scmp.eq.s32.totalorder %s1062_s26, 1 }
   0x8   : > { %s1494_s30 = scalar_select %p155_p1, %s1414_s23, %s157_s28  }
   0x9   : > { %p1496_p5 = por %p168_p2, %p167_p0  ;;  %p1500_p6 = por %p174_p4, %p173_p3 }
   0xa   : > { %p1065_p7 = scmp.ge.s32.totalorder %s1418_s24, 1  ;;  %p215_p8 = scmp.lt.s32.totalorder %s1418_s24, 3 }
   0xc   : > { %p216_p9 = pnand %p1065_p7, %p215_p8 }
   0xd   : > { %p244_p10 = scmp.lt.s32.totalorder (!%p216_p9), %s1479_s25, 1  ;;  %s242_s29 = sand.u32 (!%p216_p9), 1, %s1410_s22  }
   0xe   : > { %219 = sbr.rel (%p216_p9) target bundleno = 950 (0x3b6), region = 44  ;;  %s1126_s9 = sshll.u32 (!%p216_p9), %s1479_s25, 4 }
   0xf   : > { %s243_s10 = scalar_lea.vmem (!%p216_p9), [#allocation2], %s242_s29  ;;  %s995_s15 = scalar_lea.sflag (!%p216_p9), [#allocation3], %s242_s29 }
  0x10   : > { %s1007_s11 = sshll.u32 (!%p216_p9), %s243_s10, 4  ;;  %s1708_s11 = int_to_ptr.vmem [resolvable:$true] %s1007_s11 }
  0x11   : > { %s1358_s16 = scalar_lea.vmem (!%p216_p9), %s1708_s11, 16 }
  0x12   : > { %p1359_p11 = scmp.ne.s32.totalorder (!%p216_p9), %s1708_s11, %s1358_s16 }
  0x13   : > { %v1312_v0 = vld [vmem:[%s1748_s1 + $0x8] sm:$0xff]   ;;  %v1313_v1 = vld [vmem:[%s1748_s1] sm:$0xff]   ;;  %s245_s13 = scalar_select %p244_p10, %s1479_s25, 1  ;;  %vm383_vm0 = vcmask 261120   ;;  %v1330_v18 = vld [vmem:[%s1749_s2 + $0x38] sm:$0xff]   ;;  %v1420_v19 = vmov 0.0   ;;  %v287_v27 = vlaneseq }
  0x14   : > { %1175 = vmatprep.subr.bf16.mxu0 %v1312_v0  ;;  %1211 = vmatprep.subr.bf16.mxu1 %v1420_v19  ;;  %v1331_v20 = vld [vmem:[%s1749_s2 + $0x30] sm:$0xff]   ;;  %v1332_v21 = vld [vmem:[%s1749_s2 + $0x28] sm:$0xff]   ;;  %v1333_v22 = vld [vmem:[%s1749_s2 + $0x20] sm:$0xff]   ;;  %vm1421_vm1 = vmmov 0   ;;  %p1360_p12 = pnand %p1359_p11, %p1496_p5  ;;  %s1422_s25 = smov [#allocation2]  }
  0x15   : > { %1176 = vmatpush3.bf16.msra.mxu0 %v1312_v0  ;;  %s1129_s14 = sshll.u32 %s245_s13, 7  ;;  %1212 = vmatpush3.bf16.msra.mxu1 %v1330_v18  ;;  %v1334_v23 = vld [vmem:[%s1749_s2 + $0x18] sm:$0xff]   ;;  %v1335_v24 = vld [vmem:[%s1749_s2 + $0x10] sm:$0xff]   ;;  %v1336_v25 = vld [vmem:[%s1749_s2 + $0x8] sm:$0xff]   ;;  %v288_v28 = vshrl.u32 %v287_v27, 7 }
  0x16   : > { %1177 = vmatprep.subr.bf16.mxu0 %v1313_v1  ;;  %s1517_s17 = scalar_lea.vmem %s1747_s0, %s1129_s14  ;;  %1213 = vmatprep.subr.bf16.mxu1 %v1420_v19  ;;  %v1337_v26 = vld [vmem:[%s1749_s2] sm:$0xff]   ;;  %s1706_s14 = scalar_lea.hbm %s1753_s6, %s1126_s9 }
  0x17   : > { %v1314_v2 = vld [vmem:[%s1517_s17] sm:$0xff]   ;;  %v1315_v3 = vld [vmem:[%s1517_s17 + $0x8] sm:$0xff]   ;;  %v1316_v4 = vld [vmem:[%s1517_s17 + $0x10] sm:$0xff]   ;;  %1227 = vmatprep.mubr.msk.bf16.mxu1 %vm1421_vm1, %v1420_v19  ;;  %v289_v29 = vsub.s32 0, %v288_v28  ;;  %p1361_p13 = pneg %p1360_p12 }
  0x18   : > { %1179 = vmatprep.mubr.msk.bf16.mxu0 %vm383_vm0, %v1314_v2  ;;  %v1317_v5 = vld [vmem:[%s1517_s17 + $0x18] sm:$0xff]   ;;  %v1318_v6 = vld [vmem:[%s1517_s17 + $0x20] sm:$0xff]   ;;  %v1319_v7 = vld [vmem:[%s1517_s17 + $0x28] sm:$0xff]  }
  0x19   : > { %1178 = vmatpush3.bf16.msra.mxu0 %v1313_v1  ;;  %v1320_v8 = vld [vmem:[%s1517_s17 + $0x30] sm:$0xff]   ;;  %v1321_v9 = vld [vmem:[%s1517_s17 + $0x38] sm:$0xff]   ;;  %v1322_v10 = vld [vmem:[%s1517_s17 + $0x40] sm:$0xff]   ;;  %1214 = vmatpush3.bf16.msra.mxu1 %v1331_v20 }
  0x1a   : > { %v1323_v11 = vld [vmem:[%s1517_s17 + $0x48] sm:$0xff]   ;;  %v1324_v12 = vld [vmem:[%s1517_s17 + $0x50] sm:$0xff]   ;;  %v1325_v13 = vld [vmem:[%s1517_s17 + $0x58] sm:$0xff]   ;;  %1251 = vmatprep.subr.bf16.mxu0 %v1420_v19  ;;  %1215 = vmatprep.subr.bf16.mxu1 %v1420_v19 }
  0x1b   : > { %v1326_v14 = vld [vmem:[%s1517_s17 + $0x60] sm:$0xff]   ;;  %v1327_v15 = vld [vmem:[%s1517_s17 + $0x68] sm:$0xff]   ;;  %v1328_v16 = vld [vmem:[%s1517_s17 + $0x70] sm:$0xff]  }
  0x1c   : > { %1180 = vmatmul.mubr.msk.bf16.vlgmr.msra.gmra.mxu0 %vm383_vm0, %v1315_v3  ;;  %v1329_v17 = vld [vmem:[%s1517_s17 + $0x78] sm:$0xff]   ;;  %v1592_v30 = vld [vmem:[%s1752_s5] sm:$0xff]  ;;  %s1362_s17 = sshll.u32 %s1422_s25, 4  ;;  %s1363_s17 = int_to_ptr.vmem [resolvable:$false] %s1362_s17 }
  0x1d   : > { %1183 = vmatprep.mubr.msk.bf16.mxu0 %vm383_vm0, %v1316_v4  ;;  %1216 = vmatpush3.bf16.msra.mxu1 %v1332_v21  ;;  %v1595_v33 = vrot.slane %v1592_v30, %v289_v29  ;;  %s1364_s18 = scalar_lea.vmem %s1363_s17, 32  ;;  %p1365_p0 = scmp.lt.s32.totalorder %s1708_s11, %s1363_s17 }
  0x1e   : > { %1217 = vmatprep.subr.bf16.mxu1 %v1420_v19  ;;  %p1366_p1 = scmp.lt.s32.totalorder %s1364_s18, %s1358_s16 }
  0x20   : > { %p1367_p2 = por %p1366_p1, %p1365_p0 }
  0x21   : > { %1218 = vmatpush3.bf16.msra.mxu1 %v1333_v22 }
  0x22   : > { %1219 = vmatprep.subr.bf16.mxu1 %v1420_v19  ;;  %p1368_p3 = pnand %p1367_p2, %p1361_p13 }
  0x24   : > { %1184 = vmatmul.mubr.msk.bf16.gmra.mxu0 %vm383_vm0, %v1317_v5 }
  0x25   : > { %1187 = vmatprep.mubr.msk.bf16.mxu0 %vm383_vm0, %v1318_v6  ;;  %1220 = vmatpush3.bf16.msra.mxu1 %v1334_v23 }
  0x26   : > { %1221 = vmatprep.subr.bf16.mxu1 %v1420_v19 }
  0x29   : > { %1222 = vmatpush3.bf16.msra.mxu1 %v1335_v24 }
  0x2a   : > { %1223 = vmatprep.subr.bf16.mxu1 %v1420_v19 }
  0x2c   : > { %1188 = vmatmul.mubr.msk.bf16.gmra.mxu0 %vm383_vm0, %v1319_v7 }
  0x2d   : > { %1191 = vmatprep.mubr.msk.bf16.mxu0 %vm383_vm0, %v1320_v8  ;;  %1224 = vmatpush3.bf16.msra.mxu1 %v1336_v25 }
  0x2e   : > { %1225 = vmatprep.subr.bf16.mxu1 %v1420_v19 }
  0x31   : > { %1226 = vmatpush3.bf16.msra.mxu1 %v1337_v26 }
  0x32   : > { %1231 = vmatprep.subr.bf16.mxu1 %v1420_v19 }
  0x34   : > { %1192 = vmatmul.mubr.msk.bf16.gmra.mxu0 %vm383_vm0, %v1321_v9 }
  0x35   : > { %1195 = vmatprep.mubr.msk.bf16.mxu0 %vm383_vm0, %v1322_v10 }
  0x3c   : > { %1196 = vmatmul.mubr.msk.bf16.gmra.mxu0 %vm383_vm0, %v1323_v11 }
  0x3d   : > { %1199 = vmatprep.mubr.msk.bf16.mxu0 %vm383_vm0, %v1324_v12 }
  0x44   : > { %1200 = vmatmul.mubr.msk.bf16.gmra.mxu0 %vm383_vm0, %v1325_v13 }
  0x45   : > { %1203 = vmatprep.mubr.msk.bf16.mxu0 %vm383_vm0, %v1326_v14 }
  0x4c   : > { %1204 = vmatmul.mubr.msk.bf16.gmra.mxu0 %vm383_vm0, %v1327_v15 }
  0x4d   : > { %1207 = vmatprep.mubr.msk.bf16.mxu0 %vm383_vm0, %v1328_v16 }
  0x54   : > { %1208 = vmatmul.mubr.msk.bf16.gmra.mxu0 %vm383_vm0, %v1329_v17 }
  0x55   : > { %1267 = vmatprep.mubr.msk.bf16.mxu0 %vm1421_vm1, %v1420_v19 }
  0xdc   : > { %v1181_v31 = vpop.f32.mrf.mxu0 }
  0xdd   : > { %v475_v37 = vadd.f32 %v1181_v31, %v1595_v33 }
  0xde   : > { %v466_v32 = vpop.f32.mrf.mxu0 }
  0xdf   : > { %v467_v35 = vadd.f32 %v466_v32, %v1595_v33  ;;  %v595_v44 = vmax.f32 %v475_v37, 0.0 }
  0xe0   : > { %v1182_v34 = vpop.f32.mrf.mxu0 }
  0xe1   : > { %v593_v40 = vmax.f32 %v467_v35, 0.0  ;;  %v478_v41 = vadd.f32 %v1182_v34, %v1595_v33 }
  0xe2   : > { %v469_v36 = vpop.f32.mrf.mxu0 }
  0xe3   : > { %v470_v38 = vadd.f32 %v469_v36, %v1595_v33  ;;  %v596_v48 = vmax.f32 %v478_v41, 0.0 }
  0xe4   : > { %v1185_v39 = vpop.f32.mrf.mxu0 }
  0xe5   : > { %v594_v42 = vmax.f32 %v470_v38, 0.0  ;;  %v491_v51 = vadd.f32 %v1185_v39, %v1595_v33 }
  0xe6   : > { %v482_v43 = vpop.f32.mrf.mxu0 }
  0xe7   : > { %v625_v45 = vadd.f32 %v594_v42, %v593_v40  ;;  %v483_v46 = vadd.f32 %v482_v43, %v1595_v33  ;;  %v599_v60 = vmax.f32 %v491_v51, 0.0 }
  0xe8   : > { %v1186_v47 = vpop.f32.mrf.mxu0 }
  0xe9   : > { %v626_v49 = vadd.f32 %v625_v45, %v595_v44  ;;  %v597_v52 = vmax.f32 %v483_v46, 0.0  ;;  %v494_v57 = vadd.f32 %v1186_v47, %v1595_v33 }
  0xea   : > { %v485_v50 = vpop.f32.mrf.mxu0 }
  0xeb   : > { %v627_v53 = vadd.f32 %v626_v49, %v596_v48  ;;  %v486_v54 = vadd.f32 %v485_v50, %v1595_v33  ;;  %v600_v0 = vmax.f32 %v494_v57, 0.0 }
  0xec   : > { %v1189_v55 = vpop.f32.mrf.mxu0 }
  0xed   : > { %v628_v56 = vadd.f32 %v627_v53, %v597_v52  ;;  %v598_v58 = vmax.f32 %v486_v54, 0.0  ;;  %v507_v3 = vadd.f32 %v1189_v55, %v1595_v33 }
  0xee   : > { %v498_v59 = vpop.f32.mrf.mxu0 }
  0xef   : > { %v629_v61 = vadd.f32 %v628_v56, %v598_v58  ;;  %v499_v62 = vadd.f32 %v498_v59, %v1595_v33  ;;  %v603_v12 = vmax.f32 %v507_v3, 0.0 }
  0xf0   : > { %v1190_v63 = vpop.f32.mrf.mxu0 }
  0xf1   : > { %v630_v1 = vadd.f32 %v629_v61, %v599_v60  ;;  %v601_v4 = vmax.f32 %v499_v62, 0.0  ;;  %v510_v9 = vadd.f32 %v1190_v63, %v1595_v33 }
  0xf2   : > { %v501_v2 = vpop.f32.mrf.mxu0 }
  0xf3   : > { %v631_v5 = vadd.f32 %v630_v1, %v600_v0  ;;  %v502_v6 = vadd.f32 %v501_v2, %v1595_v33  ;;  %v604_v16 = vmax.f32 %v510_v9, 0.0 }
  0xf4   : > { %v1193_v7 = vpop.f32.mrf.mxu0 }
  0xf5   : > { %v632_v8 = vadd.f32 %v631_v5, %v601_v4  ;;  %v602_v10 = vmax.f32 %v502_v6, 0.0  ;;  %v523_v20 = vadd.f32 %v1193_v7, %v1595_v33 }
  0xf6   : > { %v514_v11 = vpop.f32.mrf.mxu0 }
  0xf7   : > { %v633_v13 = vadd.f32 %v632_v8, %v602_v10  ;;  %v515_v14 = vadd.f32 %v514_v11, %v1595_v33  ;;  %v607_v29 = vmax.f32 %v523_v20, 0.0 }
  0xf8   : > { %v1194_v15 = vpop.f32.mrf.mxu0 }
  0xf9   : > { %v634_v17 = vadd.f32 %v633_v13, %v603_v12  ;;  %v605_v21 = vmax.f32 %v515_v14, 0.0  ;;  %v526_v26 = vadd.f32 %v1194_v15, %v1595_v33 }
  0xfa   : > { %v517_v18 = vpop.f32.mrf.mxu0 }
  0xfb   : > { %v635_v22 = vadd.f32 %v634_v17, %v604_v16  ;;  %v518_v23 = vadd.f32 %v517_v18, %v1595_v33  ;;  %v608_v35 = vmax.f32 %v526_v26, 0.0 }
  0xfc   : > { %v1197_v24 = vpop.f32.mrf.mxu0 }
  0xfd   : > { %v636_v25 = vadd.f32 %v635_v22, %v605_v21  ;;  %v606_v27 = vmax.f32 %v518_v23, 0.0  ;;  %v539_v38 = vadd.f32 %v1197_v24, %v1595_v33 }
  0xfe   : > { %v530_v28 = vpop.f32.mrf.mxu0 }
  0xff   : > { %v637_v31 = vadd.f32 %v636_v25, %v606_v27  ;;  %v531_v32 = vadd.f32 %v530_v28, %v1595_v33  ;;  %v611_v47 = vmax.f32 %v539_v38, 0.0 }
 0x100   : > { %v1198_v34 = vpop.f32.mrf.mxu0 }
 0x101   : > { %v638_v36 = vadd.f32 %v637_v31, %v607_v29  ;;  %v609_v39 = vmax.f32 %v531_v32, 0.0  ;;  %v542_v44 = vadd.f32 %v1198_v34, %v1595_v33 }
 0x102   : > { %v533_v37 = vpop.f32.mrf.mxu0 }
 0x103   : > { %v639_v40 = vadd.f32 %v638_v36, %v608_v35  ;;  %v534_v41 = vadd.f32 %v533_v37, %v1595_v33  ;;  %v612_v51 = vmax.f32 %v542_v44, 0.0  ;;  %v1338_v44 = vld [vmem:[%s1750_s3 + $0x38] sm:$0xff]  }
 0x104   : > { %v1201_v42 = vpop.f32.mrf.mxu0 }
 0x105   : > { %v640_v43 = vadd.f32 %v639_v40, %v609_v39  ;;  %v610_v45 = vmax.f32 %v534_v41, 0.0  ;;  %v555_v54 = vadd.f32 %v1201_v42, %v1595_v33 }
 0x106   : > { %v546_v46 = vpop.f32.mrf.mxu0 }
 0x107   : > { %v641_v48 = vadd.f32 %v640_v43, %v610_v45  ;;  %v547_v49 = vadd.f32 %v546_v46, %v1595_v33  ;;  %v615_v63 = vmax.f32 %v555_v54, 0.0  ;;  %v1339_v45 = vld [vmem:[%s1750_s3 + $0x30] sm:$0xff]   ;;  %v1340_v46 = vld [vmem:[%s1750_s3 + $0x28] sm:$0xff]  }
 0x108   : > { %v1202_v50 = vpop.f32.mrf.mxu0  ;;  %v1348_v54 = vld [vmem:[%s1751_s4 + $0x28] sm:$0xff]  }
 0x109   : > { %v642_v52 = vadd.f32 %v641_v48, %v611_v47  ;;  %v613_v55 = vmax.f32 %v547_v49, 0.0  ;;  %v558_v60 = vadd.f32 %v1202_v50, %v1595_v33  ;;  %v1341_v47 = vld [vmem:[%s1750_s3 + $0x20] sm:$0xff]   ;;  %v1342_v48 = vld [vmem:[%s1750_s3 + $0x18] sm:$0xff]   ;;  %v1343_v49 = vld [vmem:[%s1750_s3 + $0x10] sm:$0xff]  }
 0x10a   : > { %v549_v53 = vpop.f32.mrf.mxu0  ;;  %v1344_v50 = vld [vmem:[%s1750_s3 + $0x8] sm:$0xff]  }
 0x10b   : > { %v643_v56 = vadd.f32 %v642_v52, %v612_v51  ;;  %v550_v57 = vadd.f32 %v549_v53, %v1595_v33  ;;  %v616_v3 = vmax.f32 %v558_v60, 0.0  ;;  %v1345_v51 = vld [vmem:[%s1750_s3] sm:$0xff]   ;;  %v1346_v52 = vld [vmem:[%s1751_s4 + $0x38] sm:$0xff]   ;;  %v1347_v53 = vld [vmem:[%s1751_s4 + $0x30] sm:$0xff]  }
 0x10c   : > { %v1205_v58 = vpop.f32.mrf.mxu0  ;;  %1252 = vmatpush3.bf16.msra.mxu0 %v1346_v52 }
 0x10d   : > { %v644_v59 = vadd.f32 %v643_v56, %v613_v55  ;;  %v614_v61 = vmax.f32 %v550_v57, 0.0  ;;  %v571_v6 = vadd.f32 %v1205_v58, %v1595_v33  ;;  %1253 = vmatprep.subr.bf16.mxu0 %v1420_v19  ;;  %v729_v55 = vrot.slane %v1592_v30, 1 }
 0x10e   : > { %v562_v62 = vpop.f32.mrf.mxu0 }
 0x10f   : > { %v645_v0 = vadd.f32 %v644_v59, %v614_v61  ;;  %v563_v1 = vadd.f32 %v562_v62, %v1595_v33  ;;  %v619_v15 = vmax.f32 %v571_v6, 0.0 }
 0x110   : > { %v1206_v2 = vpop.f32.mrf.mxu0  ;;  %1254 = vmatpush3.bf16.msra.mxu0 %v1347_v53 }
 0x111   : > { %v646_v4 = vadd.f32 %v645_v0, %v615_v63  ;;  %v617_v7 = vmax.f32 %v563_v1, 0.0  ;;  %v574_v12 = vadd.f32 %v1206_v2, %v1595_v33  ;;  %1255 = vmatprep.subr.bf16.mxu0 %v1420_v19  ;;  %v1349_v63 = vld [vmem:[%s1751_s4 + $0x20] sm:$0xff]   ;;  %v1350_v0 = vld [vmem:[%s1751_s4 + $0x18] sm:$0xff]   ;;  %v1351_v1 = vld [vmem:[%s1751_s4 + $0x10] sm:$0xff]  }
 0x112   : > { %v565_v5 = vpop.f32.mrf.mxu0  ;;  %v1352_v2 = vld [vmem:[%s1751_s4 + $0x8] sm:$0xff]  }
 0x113   : > { %v647_v8 = vadd.f32 %v646_v4, %v616_v3  ;;  %v566_v9 = vadd.f32 %v565_v5, %v1595_v33  ;;  %v620_v20 = vmax.f32 %v574_v12, 0.0  ;;  %v1353_v3 = vld [vmem:[%s1751_s4] sm:$0xff]   ;;  %v837_v4 = vrot.slane %v1592_v30, 2 }
 0x114   : > { %v1209_v10 = vpop.f32.mrf.mxu0  ;;  %1256 = vmatpush3.bf16.msra.mxu0 %v1348_v54 }
 0x115   : > { %v648_v11 = vadd.f32 %v647_v8, %v617_v7  ;;  %v618_v13 = vmax.f32 %v566_v9, 0.0  ;;  %v587_v23 = vadd.f32 %v1209_v10, %v1595_v33  ;;  %1257 = vmatprep.subr.bf16.mxu0 %v1420_v19 }
 0x116   : > { %v578_v14 = vpop.f32.mrf.mxu0 }
 0x117   : > { %v649_v16 = vadd.f32 %v648_v11, %v618_v13  ;;  %v579_v17 = vadd.f32 %v578_v14, %v1595_v33  ;;  %v623_v31 = vmax.f32 %v587_v23, 0.0 }
 0x118   : > { %v1210_v18 = vpop.f32.mrf.mxu0  ;;  %1258 = vmatpush3.bf16.msra.mxu0 %v1349_v63 }
 0x119   : > { %v650_v21 = vadd.f32 %v649_v16, %v619_v15  ;;  %v621_v24 = vmax.f32 %v579_v17, 0.0  ;;  %v590_v28 = vadd.f32 %v1210_v18, %v1595_v33  ;;  %1259 = vmatprep.subr.bf16.mxu0 %v1420_v19  ;;  %v951_v16 = vrot.slane %v1592_v30, 3 }
 0x11a   : > { %v581_v22 = vpop.f32.mrf.mxu0 }
 0x11b   : > { %v651_v25 = vadd.f32 %v650_v21, %v620_v20  ;;  %v582_v26 = vadd.f32 %v581_v22, %v1595_v33  ;;  %v624_v34 = vmax.f32 %v590_v28, 0.0 }
 0x11c   : > { %1260 = vmatpush3.bf16.msra.mxu0 %v1350_v0 }
 0x11d   : > { %v652_v27 = vadd.f32 %v651_v25, %v621_v24  ;;  %v622_v29 = vmax.f32 %v582_v26, 0.0  ;;  %1261 = vmatprep.subr.bf16.mxu0 %v1420_v19 }
 0x11f   : > { %v653_v32 = vadd.f32 %v652_v27, %v622_v29 }
 0x120   : > { %1262 = vmatpush3.bf16.msra.mxu0 %v1351_v1 }
 0x121   : > { %v654_v35 = vadd.f32 %v653_v32, %v623_v31  ;;  %1263 = vmatprep.subr.bf16.mxu0 %v1420_v19 }
 0x123   : > { %v655_v36 = vadd.f32 %v654_v35, %v624_v34 }
 0x124   : > { %1264 = vmatpush3.bf16.msra.mxu0 %v1352_v2 }
 0x125   : > { %v656_v37 = vrot.slane %v655_v36, 4  ;;  %1265 = vmatprep.subr.bf16.mxu0 %v1420_v19 }
 0x127   : > { %v657_v38 = vadd.f32 %v656_v37, %v655_v36 }
 0x128   : > { %1266 = vmatpush3.bf16.msra.mxu0 %v1353_v3 }
 0x129   : > { %v658_v39 = vrot.slane %v657_v38, 2 }
 0x12b   : > { %v659_v40 = vadd.f32 %v658_v39, %v657_v38 }
 0x12d   : > { %v660_v41 = vrot.slane %v659_v40, 1 }
 0x12f   : > { %v661_v42 = vadd.f32 %v660_v41, %v659_v40 }
 0x131   : > { %v1629_v43 = vmul.f32 0.00390625, %v661_v42 }
 0x133   : > { %v663_v33 = vpack.c.bf16 %v1629_v43, %v1629_v43 }
 0x135   : > { %1228 = vmatmul.mubr.bf16.vlgmr.msra.gmra.mxu1 %v663_v33 }
 0x136   : > { %1232 = vmatpush3.bf16.msra.mxu1 %v1338_v44  ;;  %1247 = vmatprep.mubr.msk.bf16.mxu1 %vm1421_vm1, %v1420_v19 }
 0x137   : > { %1233 = vmatprep.subr.bf16.mxu1 %v1420_v19 }
 0x13a   : > { %1234 = vmatpush3.bf16.msra.mxu1 %v1339_v45 }
 0x13b   : > { %1235 = vmatprep.subr.bf16.mxu1 %v1420_v19 }
 0x13e   : > { %1236 = vmatpush3.bf16.msra.mxu1 %v1340_v46 }
 0x13f   : > { %1237 = vmatprep.subr.bf16.mxu1 %v1420_v19 }
 0x142   : > { %1238 = vmatpush3.bf16.msra.mxu1 %v1341_v47 }
 0x143   : > { %1239 = vmatprep.subr.bf16.mxu1 %v1420_v19 }
 0x146   : > { %1240 = vmatpush3.bf16.msra.mxu1 %v1342_v48 }
 0x147   : > { %1241 = vmatprep.subr.bf16.mxu1 %v1420_v19 }
 0x14a   : > { %1242 = vmatpush3.bf16.msra.mxu1 %v1343_v49 }
 0x14b   : > { %1243 = vmatprep.subr.bf16.mxu1 %v1420_v19 }
 0x14e   : > { %1244 = vmatpush3.bf16.msra.mxu1 %v1344_v50 }
 0x14f   : > { %1245 = vmatprep.subr.bf16.mxu1 %v1420_v19 }
 0x152   : > { %1246 = vmatpush3.bf16.msra.mxu1 %v1345_v51 }
 0x1f5   : > { %v765_v56 = vpop.f32.mrf.mxu1 }
 0x1f6   : > { %v766_v57 = vadd.f32 %v765_v56, %v729_v55 }
 0x1f7   : > { %v1229_v58 = vpop.f32.mrf.mxu1 }
 0x1f8   : > { %v771_v59 = vmax.f32 %v766_v57, 0.0 }
 0x1f9   : > { %v768_v60 = vpop.f32.mrf.mxu1 }
 0x1fa   : > { %v772_v61 = vpack.c.bf16 %v771_v59, %v771_v59 }
 0x1fb   : > { %v1230_v62 = vpop.f32.mrf.mxu1 }
 0x1fc   : > { %1248 = vmatmul.mubr.bf16.vlgmr.msra.gmra.mxu1 %v772_v61 }
 0x2bc   : > { %v873_v5 = vpop.f32.mrf.mxu1 }
 0x2bd   : > { %v874_v6 = vadd.f32 %v873_v5, %v837_v4 }
 0x2be   : > { %v1249_v7 = vpop.f32.mrf.mxu1 }
 0x2bf   : > { %v879_v8 = vsub.f32 0.0, %v874_v6 }
 0x2c0   : > { %v876_v9 = vpop.f32.mrf.mxu1 }
 0x2c1   : > { %v880_v10 = vmul.f32 1.442695, %v879_v8 }
 0x2c2   : > { %v1250_v11 = vpop.f32.mrf.mxu1 }
 0x2c3   : > { %1354 = vpow2.f32 %v880_v10 }
 0x2d0   : > { %v1355_v12 = vpop.eup %1354 }
 0x2d1   : > { %v882_v13 = vadd.f32 1.0, %v1355_v12 }
 0x2d3   : > { %1356 = vrcp.f32 %v882_v13 }
 0x2e0   : > { %v1357_v14 = vpop.eup %1356 }
 0x2e1   : > { %v885_v15 = vmul.f32 %v1357_v14, %v1629_v43 }
 0x2e3   : > { %v886_v19 = vpack.c.bf16 %v885_v15, %v885_v15 }
 0x2e5   : > { %1268 = vmatmul.mubr.bf16.vlgmr.msra.gmra.mxu0 %v886_v19 }
 0x3a5   : > { %v987_v17 = vpop.f32.mrf.mxu0 }
 0x3a6   : > { %v988_v18 = vadd.f32 %v987_v17, %v951_v16 }
 0x3a7   : > { %v1269_v20 = vpop.f32.mrf.mxu0 }
 0x3a8   : > { %993 = vst [vmem:[%s243_s10] sm:$0x1] %v988_v18 }
 0x3a9   : > { %v990_v21 = vpop.f32.mrf.mxu0 }
 0x3aa   : > { %1371 = shalt.err (!%p1368_p3)
}
 0x3ab   : > { %s1372_s19 = scalar_lea.hbm %s1706_s14, 16  ;;  %s1376_s28 = scalar_lea.hbm %s1753_s6, 32 }
 0x3ac   : > { %p1373_p4 = scmp.ne.s32.totalorder %s1706_s14, %s1372_s19  ;;  %p1377_p9 = scmp.lt.s32.totalorder %s1706_s14, %s1753_s6 }
 0x3ad   : > { %p1378_p10 = scmp.lt.s32.totalorder %s1376_s28, %s1372_s19 }
 0x3ae   : > { %p1374_p7 = pnand %p1373_p4, %p1496_p5 }
 0x3af   : > { %p1379_p11 = por %p1378_p10, %p1377_p9 }
 0x3b0   : > { %p1375_p8 = pneg %p1374_p7 }
 0x3b2   : > { %p1380_p12 = pnand %p1379_p11, %p1375_p8 }
 0x3b4   : > { %1383 = shalt.err (!%p1380_p12)
}
 0x3b5   : > { %1271 = dma.vmem_to_hbm [thread:$0]  (%p1496_p5), %s1708_s11, 16, %s1706_s14, %s995_s15   ;;  %v1270_v30 = vpop.f32.mrf.mxu0 }
 0x3b6 PF: > { %p1277_p13 = scmp.ge.s32.totalorder %s1418_s24, 2  ;;  %s1019_s10 = sand.u32 1, %s1406_s21  }
 0x3b7   : > { %s1020_s12 = scalar_lea.sflag [#allocation3], %s1019_s10 }
 0x3b8   : > { %p1274_p0 = pnand %p1277_p13, %p1500_p6 }
 0x3ba   : > { %p1275_p1 = pneg %p1274_p0 }
 0x3bc   : > { %1401 = dma.done.wait (%p1275_p1), %s1020_s12, 16  }
 0x3bd   : > { %1403 = vsyncadd (%p1275_p1), %s1020_s12, 4294967280  ;;  %p16_p2 = scmp.ge.s32.totalorder %s1483_s27, 4   ;;  %s1756_s21 = smov %s1410_s22 }
 0x3be   : > { %s1757_s22 = smov %s1414_s23  ;;  %s1758_s23 = smov %s1494_s30 }
 0x3bf   : > { %s1759_s24 = smov %s1483_s27  ;;  %18 = sbr.rel (!%p16_p2) target bundleno = 3 (0x3), region = 79 }
 0x3c4   :  { %1024 = vsyncpa [#allocation3], 1 }
 0x3c5   :  { %1026 = vsyncpa [#allocation3 + $0x1], 1 }

</bundles_post_ra>
